<compile_context>
chip_gen: v6e
topology: v6e:2x2x1
jax: 0.10.0
libtpu: 0.0.40
codegen_flags: <defaults>
</compile_context>

<pallas_src>
import functools

import numpy as np
import jax
import jax.numpy as jnp
from jax import lax
from jax.experimental import pallas as pl
from jax.experimental.pallas import tpu as pltpu


# ---------------------------------------------------------------------------
# Kernel A: fused QKV projection (one lane-dense bf16 MXU matmul per tile)
# ---------------------------------------------------------------------------
def _qkv_proj_kernel(x_ref, w_ref, o_ref):
    x = x_ref[0].astype(jnp.bfloat16)                       # (Tn, DIM)
    o_ref[0] = jnp.dot(x, w_ref[...],                       # (Tn, 3*H*D), f32 acc
                       preferred_element_type=jnp.float32).astype(jnp.bfloat16)


# ---------------------------------------------------------------------------
# Kernel B: attention + re-attention mixing + head-axis LN + attn@V + out-proj
# ---------------------------------------------------------------------------
def _reattention_kernel(q_ref, k_ref, v_ref, wt_ref, gamma_ref, beta_ref,
                        wout_ref, bout_ref, o_ref,
                        attn_s, mixed_s, mean_s, inv_s,
                        *, heads, scale, eps):
    H = heads
    Tq = attn_s.shape[1]
    DIM = o_ref.shape[2]
    inv_h = 1.0 / float(H)

    # ---- Phase 1: per-head scores + softmax, one (Tq, N) slab live at a time
    for h in range(H):
        q_h = q_ref[0, h] * scale                            # (Tq, D) bf16, scale on q
        k_h = k_ref[0, h]                                    # (N,  D) bf16
        s = lax.dot_general(q_h, k_h, (((1,), (1,)), ((), ())),
                            preferred_element_type=jnp.float32)      # (Tq, N) f32
        s = s - jnp.max(s, axis=-1, keepdims=True)
        e = jnp.exp(s)
        attn_s[h] = e * pl.reciprocal(
            jnp.sum(e, axis=-1, keepdims=True), approx=True)

    # ---- Phase 2: re-attention mixing (SMEM scalar weights) + one-pass LN stats
    mean_s[...] = jnp.zeros_like(mean_s)
    inv_s[...] = jnp.zeros_like(inv_s)
    for g in range(H):
        mixed_s[g] = attn_s[0] * wt_ref[0, g]                # mixed[g] = sum_h W[h,g]*attn[h]
        for h in range(1, H):
            mixed_s[g] += attn_s[h] * wt_ref[h, g]
        m = mixed_s[g]
        mean_s[...] += m                                     # running sum
        inv_s[...] += m * m                                  # running sum of squares

    # ---- Phase 3: finalize LN statistics (mean / inv-std kept in scratch)
    mean = mean_s[...] * inv_h
    var = inv_s[...] * inv_h - mean * mean                   # E[x^2] - E[x]^2
    mean_s[...] = mean
    inv_s[...] = lax.rsqrt(var + eps)

    # ---- Phase 4: per-head LN + attn@V + per-head slice of the output
    #      projection, accumulated into the lane-dense (Tq, DIM) output tile.
    o_ref[0] = jnp.broadcast_to(bout_ref[...], (Tq, DIM))    # bias folded into init
    for g in range(H):
        normed = ((mixed_s[g] - mean_s[...]) * inv_s[...]
                  * gamma_ref[g] + beta_ref[g])               # (Tq, N) f32
        av = jnp.dot(normed.astype(jnp.bfloat16), v_ref[0, g],
                     preferred_element_type=jnp.float32)      # (Tq, D) f32
        o_ref[0] += jnp.dot(av.astype(jnp.bfloat16), wout_ref[g],
                            preferred_element_type=jnp.float32)  # (Tq, DIM) f32


def _pick_tile(n, preferred):
    """Use `preferred` if it evenly tiles n, else fall back to the full extent."""
    return preferred if (n >= preferred and n % preferred == 0) else n


def reattention_pallas(x, w_qkv, reattn_weig, ln_gamma, ln_beta, w_out, b_out,
                       *, heads, dim_head):
    B, N, DIM = x.shape
    H, D = heads, dim_head
    HD = H * D
    assert w_qkv.shape == (DIM, 3 * HD)
    assert w_out.shape == (HD, DIM)

    # Parameter prep (layout plumbing only; big weights stay lane-dense).
    w_qkv_bf = w_qkv.astype(jnp.bfloat16)                      # (DIM, 3*H*D)
    w_out_bf = w_out.reshape(H, D, DIM).astype(jnp.bfloat16)   # per-head slabs
    wt = reattn_weig.astype(jnp.float32)                       # (H, H)  -> SMEM
    gamma = ln_gamma.astype(jnp.float32)                       # (H,)    -> SMEM
    beta = ln_beta.astype(jnp.float32)                         # (H,)    -> SMEM
    bout = b_out.reshape(1, DIM).astype(jnp.float32)

    # ---- Kernel A: fused QKV projection -----------------------------------
    Tn = _pick_tile(N, 256)
    qkv = pl.pallas_call(
        _qkv_proj_kernel,
        out_shape=jax.ShapeDtypeStruct((B, N, 3 * HD), jnp.bfloat16),
        grid=(B, N // Tn),
        in_specs=[
            pl.BlockSpec((1, Tn, DIM), lambda b, t: (b, t, 0)),
            pl.BlockSpec((DIM, 3 * HD), lambda b, t: (0, 0)),
        ],
        out_specs=pl.BlockSpec((1, Tn, 3 * HD), lambda b, t: (b, t, 0)),
        compiler_params=pltpu.CompilerParams(
            dimension_semantics=("parallel", "parallel")),
    )(x, w_qkv_bf)

    # Layout plumbing (XLA copy): split heads into contiguous (B, H, N, D) slabs
    # so in-kernel per-head loads are free ref-views, not 16-lane slices.
    qkv = qkv.reshape(B, N, 3, H, D).transpose(2, 0, 3, 1, 4)
    q, k, v = qkv[0], qkv[1], qkv[2]

    # ---- Kernel B: attention / re-attention / LN / attn@V / out-proj ------
    Tq = _pick_tile(N, 128)
    kernel = functools.partial(_reattention_kernel, heads=H,
                               scale=float(D) ** -0.5, eps=1e-5)
    out = pl.pallas_call(
        kernel,
        out_shape=jax.ShapeDtypeStruct((B, N, DIM), jnp.float32),
        grid=(B, N // Tq),
        in_specs=[
            pl.BlockSpec((1, H, Tq, D), lambda b, t: (b, 0, t, 0)),   # q tile
            pl.BlockSpec((1, H, N, D), lambda b, t: (b, 0, 0, 0)),    # k (full)
            pl.BlockSpec((1, H, N, D), lambda b, t: (b, 0, 0, 0)),    # v (full)
            pl.BlockSpec(memory_space=pltpu.MemorySpace.SMEM),        # reattn W (H,H)
            pl.BlockSpec(memory_space=pltpu.MemorySpace.SMEM),        # LN gamma (H,)
            pl.BlockSpec(memory_space=pltpu.MemorySpace.SMEM),        # LN beta  (H,)
            pl.BlockSpec((H, D, DIM), lambda b, t: (0, 0, 0)),        # out-proj W
            pl.BlockSpec((1, DIM), lambda b, t: (0, 0)),              # out-proj bias
        ],
        out_specs=pl.BlockSpec((1, Tq, DIM), lambda b, t: (b, t, 0)),
        scratch_shapes=[
            pltpu.VMEM((H, Tq, N), jnp.float32),    # softmax(QK^T), per head
            pltpu.VMEM((H, Tq, N), jnp.float32),    # re-attention mix, per head
            pltpu.VMEM((Tq, N), jnp.float32),       # LN mean  (sum -> mean)
            pltpu.VMEM((Tq, N), jnp.float32),       # LN inv-std (sumsq -> rsqrt)
        ],
        compiler_params=pltpu.CompilerParams(
            dimension_semantics=("parallel", "parallel"),
            vmem_limit_bytes=48 * 1024 * 1024),
    )(q, k, v, wt, gamma, beta, w_out_bf, bout)
    return out


def reattention_ref(x, w_qkv, reattn_weig, ln_gamma, ln_beta, w_out, b_out,
                    *, heads, dim_head):
    """Pure-JAX (f32) reference mirroring the PyTorch forward pass."""
    B, N, DIM = x.shape
    H, D = heads, dim_head
    qkv = x @ w_qkv
    q, k, v = jnp.split(qkv, 3, axis=-1)
    to_heads = lambda t: t.reshape(B, N, H, D).transpose(0, 2, 1, 3)
    q, k, v = to_heads(q), to_heads(k), to_heads(v)
    s = jnp.einsum('bhid,bhjd->bhij', q, k) * (float(D) ** -0.5)
    a = jax.nn.softmax(s, axis=-1)
    a = jnp.einsum('bhij,hg->bgij', a, reattn_weig)
    at = a.transpose(0, 2, 3, 1)                     # b i j h
    mean = at.mean(-1, keepdims=True)
    var = ((at - mean) ** 2).mean(-1, keepdims=True)
    at = (at - mean) / jnp.sqrt(var + 1e-5) * ln_gamma + ln_beta
    a = at.transpose(0, 3, 1, 2)                     # b h i j
    out = jnp.einsum('bhij,bhjd->bhid', a, v)
    out = out.transpose(0, 2, 1, 3).reshape(B, N, H * D)
    return out @ w_out + b_out.reshape(1, DIM)


if __name__ == "__main__":
    B, N, DIM = 2, 8, 32          # batch, tokens, model dim
    HEADS, DIM_HEAD = 8, 16       # internal_dim = 128

    key = jax.random.PRNGKey(0)
    kx, kqkv, kweig, kout, kbias = jax.random.split(key, 5)
    x = jax.random.normal(kx, (B, N, DIM), jnp.float32)
    w_qkv = jax.random.normal(kqkv, (DIM, 3 * HEADS * DIM_HEAD), jnp.float32) * 0.05
    reattn_weig = jax.random.normal(kweig, (HEADS, HEADS), jnp.float32)
    ln_gamma = jnp.ones((HEADS,), jnp.float32)       # nn.LayerNorm default init
    ln_beta = jnp.zeros((HEADS,), jnp.float32)
    w_out = jax.random.normal(kout, (HEADS * DIM_HEAD, DIM), jnp.float32) * 0.05
    b_out = jax.random.normal(kbias, (DIM,), jnp.float32) * 0.05

    out = reattention_pallas(x, w_qkv, reattn_weig, ln_gamma, ln_beta, w_out, b_out,
                             heads=HEADS, dim_head=DIM_HEAD)
    out = jax.block_until_ready(out)

    ref = reattention_ref(x, w_qkv, reattn_weig, ln_gamma, ln_beta, w_out, b_out,
                          heads=HEADS, dim_head=DIM_HEAD)
    # Tolerance covers bf16 MXU operands (f32 accumulation) and the EUP
    # approximate reciprocal in the softmax denominator; softmax/LN stay f32.
    np.testing.assert_allclose(np.asarray(out), np.asarray(ref), rtol=5e-2, atol=5e-2)
    print("KERNEL_OK")
</pallas_src>

<mosaic_0001>
module attributes {stable_mosaic.version = 11 : i64} {
  func.func @_qkv_proj_kernel(%arg0: i32, %arg1: i32, %arg2: memref<1x8x32xf32, #tpu.memory_space<vmem>>, %arg3: memref<32x384xbf16, #tpu.memory_space<vmem>>, %arg4: memref<1x8x384xbf16, #tpu.memory_space<vmem>>) attributes {dimension_semantics = [#tpu.dimension_semantics<parallel>, #tpu.dimension_semantics<parallel>], iteration_bounds = array<i64: 2, 1>, scalar_prefetch = 0 : i64, scratch_operands = 0 : i64, tpu.core_type = #tpu.core_type<tc>, window_params = [{transform_indices = @transform_0, window_bounds = array<i64: 1, 8, 32>}, {pipeline_mode = #tpu.pipeline_mode<synchronous>, transform_indices = @transform_1, window_bounds = array<i64: 32, 384>}, {transform_indices = @transform_2, window_bounds = array<i64: 1, 8, 384>}]} {
    %c0 = arith.constant 0 : index
    %c0_0 = arith.constant 0 : index
    %c0_1 = arith.constant 0 : index
    %0 = vector.load %arg2[%c0, %c0_0, %c0_1] : memref<1x8x32xf32, #tpu.memory_space<vmem>>, vector<1x8x32xf32>
    %1 = vector.shape_cast %0 : vector<1x8x32xf32> to vector<8x32xf32>
    %2 = arith.truncf %1 : vector<8x32xf32> to vector<8x32xbf16>
    %c0_2 = arith.constant 0 : index
    %c0_3 = arith.constant 0 : index
    %3 = vector.load %arg3[%c0_2, %c0_3] : memref<32x384xbf16, #tpu.memory_space<vmem>>, vector<32x384xbf16>
    %cst = arith.constant dense<0.000000e+00> : vector<8x384xf32>
    %4 = tpu.matmul %2, %3, %cst {dimension_numbers = #tpu.dot_dimension_numbers<[1], [0], [0], [1], [0, 0, 1, 1], [], []>} : vector<8x32xbf16>, vector<32x384xbf16>, vector<8x384xf32> -> vector<8x384xf32>
    %5 = arith.truncf %4 : vector<8x384xf32> to vector<8x384xbf16>
    %c0_4 = arith.constant 0 : index
    %c0_5 = arith.constant 0 : index
    %c0_6 = arith.constant 0 : index
    %6 = vector.load %arg4[%c0_4, %c0_5, %c0_6] : memref<1x8x384xbf16, #tpu.memory_space<vmem>>, vector<1x8x384xbf16>
    %7 = vector.shape_cast %6 : vector<1x8x384xbf16> to vector<8x384xbf16>
    %8 = vector.shape_cast %5 : vector<8x384xbf16> to vector<1x8x384xbf16>
    tpu.vector_store %arg4[%c0_4, %c0_5, %c0_6], %8 {strides = array<i32>} : memref<1x8x384xbf16, #tpu.memory_space<vmem>>, vector<1x8x384xbf16>,
    return
  }
  func.func @transform_0(%arg0: i32, %arg1: i32) -> (i32, i32, i32) {
    %c0_i32 = arith.constant 0 : i32
    %c0_i32_0 = arith.constant 0 : i32
    return %arg0, %arg1, %c0_i32 : i32, i32, i32
  }
  func.func @transform_1(%arg0: i32, %arg1: i32) -> (i32, i32) {
    %c0_i32 = arith.constant 0 : i32
    %c0_i32_0 = arith.constant 0 : i32
    %c0_i32_1 = arith.constant 0 : i32
    return %c0_i32, %c0_i32_0 : i32, i32
  }
  func.func @transform_2(%arg0: i32, %arg1: i32) -> (i32, i32, i32) {
    %c0_i32 = arith.constant 0 : i32
    %c0_i32_0 = arith.constant 0 : i32
    return %arg0, %arg1, %c0_i32 : i32, i32, i32
  }
}

</mosaic_0001>

<bundles_post_ra>
// kernel: tpu_custom_call.1
= control target key start
LH: loop header
LB: loop body
LE: loop exit
PB: predicated region body
PF: predicated region fallthrough
CT: control target
= control target key end

     0   :  { %7 = vsyncpa [#allocation3], 0  ;;  %s910_s0 = inlined_call_operand.hbm [shape: f32[2,8,32], index: 0, kind: input, shape index: {}]   ;;  %s911_s1 = inlined_call_operand.hbm [shape: bf16[32,384], index: 1, kind: input, shape index: {}]   ;;  %s912_s2 = inlined_call_operand.hbm [shape: bf16[2,8,384], index: 2, kind: output, shape index: {}]  }
   0x1   :  { %9 = vsyncpa [#allocation3 + $0x1], 0 }
   0x2   :  { %10 = vsyncpa [#allocation6], 0 }
   0x3   :  { %11 = vsyncpa [#allocation4], 0 }
   0x4   :  { %13 = vsyncpa [#allocation4 + $0x1], 0  ;;  %s730_s9 = smov 0   ;;  %s732_s10 = smov 0  }
   0x5   :  { %s734_s11 = smov 0   ;;  %s736_s12 = smov 0  }
   0x6   :  { %s738_s13 = smov 0   ;;  %s740_s14 = smov 0  }
   0x7 LB: > { %s443_s15 = sadd.s32 4294967295, %s705_s14   ;;  %s444_s16 = sadd.s32 4294967294, %s705_s14   ;;  %s705_s14 = sphi %s740_s14, %s19_s14   ;;  %s701_s13 = sphi %s738_s13, %s930_s13   ;;  %s697_s12 = sphi %s736_s12, %s929_s12   ;;  %s693_s11 = sphi %s734_s11, %s928_s11   ;;  %s689_s10 = sphi %s732_s10, %s927_s10   ;;  %s685_s9 = sphi %s730_s9, %s926_s9  }
   0x8   : > { %p53_p0 = scmp.ne.s32.totalorder %s689_s10, %s685_s9  ;;  %p764_p1 = scmp.eq.s32.totalorder %s443_s15, 0 }
   0x9   : > { %p768_p2 = scmp.eq.s32.totalorder %s443_s15, 1  ;;  %p106_p3 = scmp.eq.s32.totalorder %s444_s16, 1 }
   0xa   : > { %p774_p4 = por %p764_p1, %p53_p0  ;;  %p445_p5 = scmp.ge.s32.totalorder %s705_s14, 1 }
   0xb   : > { %p779_p6 = por %p106_p3, %p53_p0  ;;  %p113_p7 = scmp.lt.s32.totalorder %s705_s14, 3 }
   0xc   : > { %s916_s19 = scalar_select %p774_p4, 1, 0 }
   0xd   : > { %s917_s20 = scalar_select %p779_p6, 1, 0 }
   0xe   : > { %p784_p8 = pnand %p445_p5, %p113_p7  ;;  %s707_s22 = smov [#allocation5]  }
   0xf   : > { %s125_s23 = sshll.u32 %s707_s22, 4  ;;  %s31_s25 = sadd.s32 1, %s701_s13  ;;  %s126_s23 = int_to_ptr.vmem [resolvable:$true] %s125_s23 }
  0x10   : > { %p489_p9 = pneg %p784_p8  ;;  %s578_s26 = scalar_lea.vmem %s126_s23, 768 }
  0x11   : > { %p579_p13 = scmp.ne.s32.totalorder %s126_s23, %s578_s26  ;;  %p586_p5 = scmp.lt.s32.totalorder %s126_s23, %s126_s23 }
  0x12   : > { %p793_p11 = pnand %p489_p9, %p764_p1  ;;  %p587_p7 = scmp.lt.s32.totalorder %s578_s26, %s578_s26 }
  0x14   : > { %p569_p12 = pneg %p793_p11  ;;  %p588_p6 = por %p587_p7, %p586_p5 }
  0x16   : > { %p581_p0 = pnand %p579_p13, %p569_p12 }
  0x18   : > { %p582_p3 = pneg %p581_p0 }
  0x1a   : > { %p589_p4 = pnand %p588_p6, %p582_p3 }
  0x1c   : > { %592 = shalt.err (!%p589_p4)
}
  0x1d   : > { %s708_s27 = smov 192   ;;  %s709_s28 = smov 12  }
  0x1e   : > { %492 = dma.hbm_to_vmem [thread:$0]  (!%p793_p11), %s911_s1, 768, %s126_s23, [#allocation6], %s708_s27, %s708_s27, %s709_s28  }
  0x1f   : > { %p33_p6 = scmp.ge.s32.totalorder %s31_s25, 2  ;;  %s40_s3 = sadd.s32 1, %s693_s11 }
  0x20   : > { %p47_p4 = scmp.ne.s32.totalorder %s693_s11, %s689_s10  ;;  %p48_p9 = scmp.eq.s32.totalorder %s705_s14, 0 }
  0x21   : > { %s932_s25 = smov (%p33_p6, %s31_s25), 0  ;;  %p502_p0 = scmp.lt.s32.totalorder %s705_s14, 2 }
  0x22   : > { %p811_p12 = por %p48_p9, %p47_p4  ;;  %p817_p13 = por %p768_p2, %p47_p4 }
  0x23   : > { %s35_s6 = ssub.s32 %s701_s13, %s932_s25  ;;  %s139_s7 = sand.u32 1, %s693_s11  }
  0x24   : > { %p38_p11 = scmp.eq.s32.totalorder %s35_s6, 0  ;;  %s448_s8 = sshll.u32 %s139_s7, 3 }
  0x25   : > { %s449_s16 = sshll.u32 %s701_s13, 7  ;;  %s143_s26 = scalar_lea.vmem [#allocation2], %s448_s8 }
  0x26   : > { %s826_s15 = scalar_select %p38_p11, %s693_s11, %s40_s3  }
  0x27   : > { %s149_s24 = scalar_lea.hbm %s910_s0, %s449_s16  ;;  %s151_s27 = sshll.u32 %s143_s26, 4  ;;  %s152_s27 = int_to_ptr.vmem [resolvable:$true] %s151_s27 }
  0x28   : > { %p834_p2 = pnand %p502_p0, %p811_p12  ;;  %s140_s28 = scalar_lea.sflag [#allocation3], %s139_s7 }
  0x29   : > { %s606_s29 = scalar_lea.vmem %s152_s27, 128  ;;  %s710_s30 = smov [#allocation2]  }
  0x2a   : > { %p595_p3 = pneg %p834_p2  ;;  %p607_p5 = scmp.ne.s32.totalorder %s152_s27, %s606_s29 }
  0x2b   : > { %s611_s3 = sshll.u32 %s710_s30, 4  ;;  %s612_s3 = int_to_ptr.vmem [resolvable:$false] %s611_s3 }
  0x2c   : > { %p609_p7 = pnand %p607_p5, %p595_p3  ;;  %s613_s6 = scalar_lea.vmem %s612_s3, 256 }
  0x2d   : > { %p614_p4 = scmp.lt.s32.totalorder %s152_s27, %s612_s3  ;;  %p615_p9 = scmp.lt.s32.totalorder %s613_s6, %s606_s29 }
  0x2e   : > { %p610_p6 = pneg %p609_p7 }
  0x2f   : > { %p616_p11 = por %p615_p9, %p614_p4 }
  0x31   : > { %p617_p10 = pnand %p616_p11, %p610_p6 }
  0x33   : > { %620 = shalt.err (!%p617_p10)
}
  0x34   : > { %496 = dma.hbm_to_vmem [thread:$0]  (!%p834_p2), %s149_s24, 128, %s152_s27, %s140_s28  }
  0x35   : > { %160 = sbr.rel (%p784_p8) target bundleno = 282 (0x11a), region = 28  ;;  %s845_s4 = sand.u32 (!%p784_p8), 1, %s689_s10  }
  0x36   : > { %s451_s7 = sshll.u32 (!%p784_p8), %s845_s4, 3  ;;  %s163_s8 = scalar_lea.sflag (!%p784_p8), [#allocation3], %s845_s4 }
  0x37   : > { %s166_s16 = scalar_lea.vmem (!%p784_p8), [#allocation2], %s451_s7  ;;  %p923_p12 = scmp.ne.s32.totalorder (!%p784_p8), %s916_s19, 0 }
  0x3a   : > { %672 = dma.done.wait (%p923_p12), %s163_s8, 128  }
  0x3b   : > { %674 = vsyncadd (%p923_p12), %s163_s8, 4294967168 }
  0x3c   : > { %676 = dma.done.wait (%p764_p1), [#allocation6], 768  }
  0x3d   : > { %678 = vsyncadd (%p764_p1), [#allocation6], 4294966528  ;;  %v711_v0 = vmov 0.0   ;;  %vm712_vm0 = vmmov 0   ;;  %v713_v1 = vmov 0   ;;  %v192_v8 = vld [vmem:[%s166_s16] sm:$0xff] }
  0x3e   : > { %471 = vmatprep.subr.bf16.mxu1 %v711_v0  ;;  %475 = vmatprep.mubr.msk.bf16.mxu1 %vm712_vm0, %v711_v0  ;;  %v559_v2 = vld [vmem:[#allocation5 + $0x1c] ss:$12 sps:$4 sm:$0xff]   ;;  %v561_v3 = vld [vmem:[#allocation5 + $0x20] ss:$12 sps:$4 sm:$0xff]   ;;  %v562_v4 = vld [vmem:[#allocation5 + $0x18] ss:$12 sps:$4 sm:$0xff]   ;;  %v193_v9 = vpack.c.bf16 %v192_v8, %v192_v8 }
  0x3f   : > { %270 = vmatprep.mubr.bf16.mxu0 %v713_v1  ;;  %250 = vmatprep.subr.bf16.mxu0 %v559_v2  ;;  %v563_v5 = vld [vmem:[#allocation5 + $0x4] ss:$12 sps:$4 sm:$0xff]   ;;  %v565_v6 = vld [vmem:[#allocation5 + $0x8] ss:$12 sps:$4 sm:$0xff]   ;;  %v566_v7 = vld [vmem:[#allocation5] ss:$12 sps:$4 sm:$0xff]  }
  0x40   : > { %472 = vmatpush3.bf16.msra.mxu1 %v561_v3  ;;  %251 = vmatpush1.bf16.msra.mxu0 %v562_v4  ;;  %vm234_vm1 = vcmask 261120   ;;  %s479_s17 = smul.u32 12, %s845_s4  ;;  %s714_s18 = smov [#allocation7]  }
  0x41   : > { %473 = vmatprep.subr.bf16.mxu1 %v711_v0  ;;  %252 = vmatprep.subr.bf16.mxu0 %v563_v5  ;;  %s480_s19 = smul.u32 192, %s697_s12  ;;  %s335_s12 = scalar_lea.sflag [#allocation4], %s845_s4 }
  0x42   : > { %s190_s21 = scalar_lea.vmem [#allocation7], %s479_s17  ;;  %s625_s28 = sshll.u32 %s714_s18, 4  ;;  %s626_s28 = int_to_ptr.vmem [resolvable:$false] %s625_s28 }
  0x43   : > { %s351_s22 = sshll.u32 %s190_s21, 4  ;;  %s862_s26 = scalar_lea.hbm %s912_s2, %s480_s19  ;;  %s864_s22 = int_to_ptr.vmem [resolvable:$true] %s351_s22 }
  0x44   : > { %474 = vmatpush3.bf16.msra.mxu1 %v565_v6  ;;  %253 = vmatpush1.bf16.msra.mxu0 %v566_v7  ;;  %s621_s27 = scalar_lea.vmem %s864_s22, 192  ;;  %s627_s29 = scalar_lea.vmem %s626_s28, 384 }
  0x45   : > { %p622_p1 = scmp.ne.s32.totalorder %s864_s22, %s621_s27  ;;  %p628_p0 = scmp.lt.s32.totalorder %s864_s22, %s626_s28 }
  0x46   : > { %p629_p2 = scmp.lt.s32.totalorder %s627_s29, %s621_s27 }
  0x47   : > { %476 = vmatmul.mubr.msk.bf16.vlgmr.msra.gmra.mxu1 %vm234_vm1, %v193_v9  ;;  %459 = vmatmul.mubr.msk.bf16.vlgmr.msra.gmra.mxu0 %vm234_vm1, %v193_v9  ;;  %p623_p8 = pnand %p622_p1, %p817_p13 }
  0x48   : > { %p630_p3 = por %p629_p2, %p628_p0 }
  0x49   : > { %p624_p10 = pneg %p623_p8 }
  0x4b   : > { %p631_p5 = pnand %p630_p3, %p624_p10 }
 0x107   : > { %v313_v10 = vpop.f32.mrf.mxu1  ;;  %v272_v12 = vpop.f32.mrf.mxu0 }
 0x108   : > { %v467_v11 = vpack.c.bf16 %v313_v10, %v313_v10 }
 0x109   : > { %v477_v13 = vpop.f32.mrf.mxu1  ;;  %v274_v14 = vpop.f32.mrf.mxu0 }
 0x10a   : > { %333 = vst [vmem:[%s190_s21 + $0x8] sm:$0xf] %v467_v11  ;;  %v466_v15 = vpack.c.bf16 %v274_v14, %v272_v12 }
 0x10b   : > { %v316_v16 = vpop.f32.mrf.mxu1  ;;  %v276_v17 = vpop.f32.mrf.mxu0 }
 0x10c   : > { %332 = vst [vmem:[%s190_s21] sm:$0xff] %v466_v15 }
 0x10d   : > { %v478_v18 = vpop.f32.mrf.mxu1  ;;  %v277_v19 = vpop.f32.mrf.mxu0 }
 0x10e   : > { %634 = shalt.err (!%p631_p5)
}
 0x10f   : > { %s635_s30 = scalar_lea.hbm %s862_s26, 192  ;;  %s639_s4 = scalar_lea.hbm %s912_s2, 384 }
 0x110   : > { %p636_p7 = scmp.ne.s32.totalorder %s862_s26, %s635_s30  ;;  %p640_p9 = scmp.lt.s32.totalorder %s862_s26, %s912_s2 }
 0x111   : > { %p641_p11 = scmp.lt.s32.totalorder %s639_s4, %s635_s30 }
 0x112   : > { %p637_p6 = pnand %p636_p7, %p817_p13 }
 0x113   : > { %p642_p12 = por %p641_p11, %p640_p9 }
 0x114   : > { %p638_p4 = pneg %p637_p6 }
 0x116   : > { %p643_p1 = pnand %p642_p12, %p638_p4 }
 0x118   : > { %646 = shalt.err (!%p643_p1)
}
 0x119   : > { %487 = dma.vmem_to_hbm [thread:$0]  (%p817_p13), %s864_s22, 192, %s862_s26, %s335_s12  }
 0x11a PF: > { %s363_s16 = sand.u32 1, %s685_s9   ;;  %p924_p8 = scmp.ne.s32.totalorder %s917_s20, 0 }
 0x11b   : > { %p925_p10 = scmp.ge.s32.totalorder %s705_s14, 2  ;;  %s364_s17 = scalar_lea.sflag [#allocation4], %s363_s16 }
 0x11d   : > { %p498_p0 = pnand %p925_p10, %p924_p8 }
 0x11f   : > { %p499_p2 = pneg %p498_p0 }
 0x121   : > { %680 = dma.done.wait (%p499_p2), %s364_s17, 192  }
 0x122   : > { %682 = vsyncadd (%p499_p2), %s364_s17, 4294967104  ;;  %s19_s14 = sadd.s32 1, %s705_s14   ;;  %s926_s9 = smov %s689_s10 }
 0x123   : > { %p16_p3 = scmp.ge.s32.totalorder %s19_s14, 4   ;;  %s927_s10 = smov %s693_s11 }
 0x124   : > { %s928_s11 = smov %s826_s15  ;;  %s929_s12 = smov %s701_s13 }
 0x125   : > { %s930_s13 = smov %s932_s25  ;;  %18 = sbr.rel (!%p16_p3) target bundleno = 7 (0x7), region = 77 }
 0x12a   :  { %369 = vsyncpa [#allocation3], 1 }
 0x12b   :  { %371 = vsyncpa [#allocation3 + $0x1], 1 }
 0x12c   :  { %372 = vsyncpa [#allocation6], 1 }
 0x12d   :  { %373 = vsyncpa [#allocation4], 1 }
 0x12e   :  { %375 = vsyncpa [#allocation4 + $0x1], 1 }

</bundles_post_ra>
